<compile_context>
chip_gen: v6e
topology: v6e:2x2x1
jax: 0.10.0
libtpu: 0.0.40
codegen_flags: <defaults>
</compile_context>

<pallas_src>
import jax
import jax.numpy as jnp
from jax import lax
from jax.experimental import pallas as pl
from jax.experimental.pallas import tpu as pltpu


def _round_up(v, m):
    return ((v + m - 1) // m) * m


def _round_down_to(v, m):
    return max(m, (v // m) * m)


def _linear_kernel_direct(x_ref, w_ref, b_ref, o_ref):
    # grid_k == 1 fast path: no accumulator scratch, single fused store.
    acc = jnp.dot(x_ref[...], w_ref[...], preferred_element_type=jnp.float32)
    o_ref[...] = (acc + b_ref[...].astype(jnp.float32)).astype(o_ref.dtype)


def _make_linear_kernel_acc(tk, k_rem):
    """K-tiled kernel with f32 accumulator; masks the ragged last K block."""

    def kernel(x_ref, w_ref, b_ref, o_ref, acc_ref):
        k = pl.program_id(2)
        nk = pl.num_programs(2)

        @pl.when(k == 0)
        def _():
            acc_ref[...] = jnp.zeros_like(acc_ref)

        x = x_ref[...]
        w = w_ref[...]
        if k_rem:
            # Valid K width of this block: tk for all but the last block.
            lim = jnp.where(k == nk - 1, k_rem, tk)
            kx = lax.broadcasted_iota(jnp.int32, x.shape, 1)
            x = jnp.where(kx < lim, x, 0)
            kw = lax.broadcasted_iota(jnp.int32, w.shape, 0)
            w = jnp.where(kw < lim, w, 0)

        acc_ref[...] += jnp.dot(x, w, preferred_element_type=jnp.float32)

        @pl.when(k == nk - 1)
        def _():
            o_ref[...] = (acc_ref[...]
                          + b_ref[...].astype(jnp.float32)).astype(o_ref.dtype)

    return kernel


def node_input_embedding(x, weight, bias, *, tile_m=None, tile_n=2048,
                         tile_k=512, vmem_budget=24 * 1024 * 1024):
    """y = x @ weight + bias, matching nn.Linear forward semantics.

    x:      [..., input_dim]   (any leading dims)
    weight: [input_dim, output_dim]   (transposed vs. PyTorch's [out, in])
    bias:   [output_dim]

    Note: x / weight / bias are expected to share a dtype; mixed dtypes will
    silently promote inside the matmul.
    """
    in_dim, out_dim = weight.shape
    lead_shape = x.shape[:-1]
    M = 1
    for d in lead_shape:
        M *= d
    x2d = x.reshape(M, in_dim)
    b2d = bias.reshape(1, out_dim)

    itemsize = jnp.dtype(x.dtype).itemsize
    sub = {4: 8, 2: 16, 1: 32}.get(itemsize, 8)

    # --- N: single full-width block when it fits (grid_n == 1 -> x streams
    #        through HBM once).  Otherwise 128-multiple tiles; the ragged last
    #        N block only costs a masked store on that edge block.
    if out_dim <= tile_n:
        tn = out_dim
        grid_n = 1
    else:
        tn = tile_n  # multiple of 128
        grid_n = pl.cdiv(out_dim, tn)

    # --- K: full reduction in one block when it fits; otherwise a bounded
    #        128-multiple tile (VMEM no longer scales with in_dim).  The
    #        ragged tail of the last K block is masked in-kernel.
    if in_dim <= tile_k:
        tk = in_dim
        grid_k = 1
        k_rem = 0
    else:
        tk = tile_k  # multiple of 128
        grid_k = pl.cdiv(in_dim, tk)
        k_rem = in_dim % tk  # 0 => no tail masking needed

    # --- M: large row tile (memory-bound op); bigger when K is small.
    if tile_m is None:
        tile_m = 1024 if (grid_k == 1 and in_dim <= 256) else 512
    tm = min(tile_m, _round_up(M, sub))
    tm = max(sub, (tm // sub) * sub)

    # --- VMEM discipline: shrink tm until the double-buffered footprint fits
    #     the budget (safe for v5e 16 MiB scoped / v7x 64 MiB physical).
    def footprint(tm_):
        b = (2 * tm_ * tk + 2 * tk * tn + 2 * tn + 2 * tm_ * tn) * itemsize
        if grid_k > 1:
            b += tm_ * tn * 4  # f32 accumulator scratch
        return b

    while tm > sub and footprint(tm) > vmem_budget:
        tm = _round_down_to(tm // 2, sub)
    grid_m = pl.cdiv(M, tm)

    # --- Megacore: make sure the parallel axes expose >= 2 blocks so both
    #     v7x TensorCores get work whenever M allows it.
    if grid_m * grid_n == 1 and tm > sub:
        tm = _round_down_to(pl.cdiv(tm, 2), sub)
        grid_m = pl.cdiv(M, tm)

    vmem_limit = int(min(max(2 * footprint(tm), 8 << 20), 48 << 20))

    cost = pl.CostEstimate(
        flops=2 * M * in_dim * out_dim,
        transcendentals=0,
        bytes_accessed=itemsize * (M * in_dim + in_dim * out_dim
                                   + out_dim + M * out_dim),
    )

    if grid_k == 1:
        kernel = _linear_kernel_direct
        grid = (grid_m, grid_n)
        in_specs = [
            pl.BlockSpec((tm, tk), lambda i, j: (i, 0)),
            pl.BlockSpec((tk, tn), lambda i, j: (0, j)),
            pl.BlockSpec((1, tn), lambda i, j: (0, j)),
        ]
        out_specs = pl.BlockSpec((tm, tn), lambda i, j: (i, j))
        scratch = []
        dims = ("parallel", "parallel")
    else:
        kernel = _make_linear_kernel_acc(tk, k_rem)
        grid = (grid_m, grid_n, grid_k)
        in_specs = [
            pl.BlockSpec((tm, tk), lambda i, j, k: (i, k)),
            pl.BlockSpec((tk, tn), lambda i, j, k: (k, j)),
            pl.BlockSpec((1, tn), lambda i, j, k: (0, j)),
        ]
        out_specs = pl.BlockSpec((tm, tn), lambda i, j, k: (i, j))
        scratch = [pltpu.VMEM((tm, tn), jnp.float32)]
        dims = ("parallel", "parallel", "arbitrary")

    out = pl.pallas_call(
        kernel,
        out_shape=jax.ShapeDtypeStruct((M, out_dim), x.dtype),
        grid_spec=pltpu.PrefetchScalarGridSpec(
            num_scalar_prefetch=0,
            grid=grid,
            in_specs=in_specs,
            out_specs=out_specs,
            scratch_shapes=scratch,
        ),
        compiler_params=pltpu.CompilerParams(
            dimension_semantics=dims,
            vmem_limit_bytes=vmem_limit,
        ),
        cost_estimate=cost,
    )(x2d, weight, b2d)

    return out.reshape(*lead_shape, out_dim)


def init_linear_params(key, input_dim, output_dim, dtype=jnp.float32):
    """Deterministic init mimicking nn.Linear defaults (kaiming-uniform-ish)."""
    k_w, k_b = jax.random.split(key)
    bound = 1.0 / (input_dim ** 0.5)
    # stored as [input_dim, output_dim] (transposed vs. PyTorch's [out, in])
    weight = jax.random.uniform(k_w, (input_dim, output_dim), dtype,
                                minval=-bound, maxval=bound)
    bias = jax.random.uniform(k_b, (output_dim,), dtype,
                              minval=-bound, maxval=bound)
    return weight, bias


if __name__ == "__main__":
    key = jax.random.PRNGKey(0)
    k_x, k_p, k_x2, k_p2 = jax.random.split(key, 4)

    # Primary case: fast path (grid_k == 1), batch=2, seq=8, 32 -> 64.
    batch, seq, input_dim, output_dim = 2, 8, 32, 64
    x = jax.random.normal(k_x, (batch, seq, input_dim), dtype=jnp.float32)
    weight, bias = init_linear_params(k_p, input_dim, output_dim)

    y = node_input_embedding(x, weight, bias)
    y = jax.block_until_ready(y)

    y_ref = x @ weight + bias
    assert y.shape == (batch, seq, output_dim)
    assert jnp.allclose(y, y_ref, atol=1e-5, rtol=1e-5)

    # Secondary case: exercise the K-tiled accumulator path with a ragged
    # last K block (in_dim=200 with tile_k=128 -> grid_k=2, tail of 72).
    in2, out2 = 200, 64
    x2 = jax.random.normal(k_x2, (batch, seq, in2), dtype=jnp.float32)
    w2, b2 = init_linear_params(k_p2, in2, out2)
    y2 = jax.block_until_ready(node_input_embedding(x2, w2, b2, tile_k=128))
    y2_ref = x2 @ w2 + b2
    assert y2.shape == (batch, seq, out2)
    assert jnp.allclose(y2, y2_ref, atol=1e-4, rtol=1e-4)

    print("KERNEL_OK")
</pallas_src>

<mosaic_0001>
module attributes {stable_mosaic.version = 11 : i64} {
  func.func @_linear_kernel_direct(%arg0: i32, %arg1: i32, %arg2: memref<8x32xf32, #tpu.memory_space<vmem>>, %arg3: memref<32x64xf32, #tpu.memory_space<vmem>>, %arg4: memref<1x64xf32, #tpu.memory_space<vmem>>, %arg5: memref<8x64xf32, #tpu.memory_space<vmem>>) attributes {dimension_semantics = [#tpu.dimension_semantics<parallel>, #tpu.dimension_semantics<parallel>], iteration_bounds = array<i64: 2, 1>, scalar_prefetch = 0 : i64, scratch_operands = 0 : i64, tpu.core_type = #tpu.core_type<tc>, window_params = [{transform_indices = @transform_0, window_bounds = array<i64: 8, 32>}, {transform_indices = @transform_1, window_bounds = array<i64: 32, 64>}, {transform_indices = @transform_2, window_bounds = array<i64: 1, 64>}, {transform_indices = @transform_3, window_bounds = array<i64: 8, 64>}]} {
    %c0 = arith.constant 0 : index
    %c0_0 = arith.constant 0 : index
    %0 = vector.load %arg2[%c0, %c0_0] : memref<8x32xf32, #tpu.memory_space<vmem>>, vector<8x32xf32>
    %c0_1 = arith.constant 0 : index
    %c0_2 = arith.constant 0 : index
    %1 = vector.load %arg3[%c0_1, %c0_2] : memref<32x64xf32, #tpu.memory_space<vmem>>, vector<32x64xf32>
    %cst = arith.constant dense<0.000000e+00> : vector<8x64xf32>
    %2 = tpu.matmul %0, %1, %cst {dimension_numbers = #tpu.dot_dimension_numbers<[1], [0], [0], [1], [0, 0, 1, 1], [], []>} : vector<8x32xf32>, vector<32x64xf32>, vector<8x64xf32> -> vector<8x64xf32>
    %c0_3 = arith.constant 0 : index
    %c0_4 = arith.constant 0 : index
    %3 = vector.load %arg4[%c0_3, %c0_4] : memref<1x64xf32, #tpu.memory_space<vmem>>, vector<1x64xf32>
    %4 = vector.broadcast %3 : vector<1x64xf32> to vector<8x64xf32>
    %5 = arith.addf %2, %4 : vector<8x64xf32>
    %c0_5 = arith.constant 0 : index
    %c0_6 = arith.constant 0 : index
    %6 = vector.load %arg5[%c0_5, %c0_6] : memref<8x64xf32, #tpu.memory_space<vmem>>, vector<8x64xf32>
    tpu.vector_store %arg5[%c0_5, %c0_6], %5 {strides = array<i32>} : memref<8x64xf32, #tpu.memory_space<vmem>>, vector<8x64xf32>,
    return
  }
  func.func @transform_0(%arg0: i32, %arg1: i32) -> (i32, i32) {
    %c0_i32 = arith.constant 0 : i32
    %c0_i32_0 = arith.constant 0 : i32
    return %arg0, %c0_i32 : i32, i32
  }
  func.func @transform_1(%arg0: i32, %arg1: i32) -> (i32, i32) {
    %c0_i32 = arith.constant 0 : i32
    %c0_i32_0 = arith.constant 0 : i32
    return %c0_i32, %arg1 : i32, i32
  }
  func.func @transform_2(%arg0: i32, %arg1: i32) -> (i32, i32) {
    %c0_i32 = arith.constant 0 : i32
    %c0_i32_0 = arith.constant 0 : i32
    return %c0_i32, %arg1 : i32, i32
  }
  func.func @transform_3(%arg0: i32, %arg1: i32) -> (i32, i32) {
    %c0_i32 = arith.constant 0 : i32
    return %arg0, %arg1 : i32, i32
  }
}

</mosaic_0001>

<bundles_post_ra>
// kernel: tpu_custom_call.1
= control target key start
LH: loop header
LB: loop body
LE: loop exit
PB: predicated region body
PF: predicated region fallthrough
CT: control target
= control target key end

     0   :  { %8 = vsyncpa [#allocation3], 0  ;;  %s896_s0 = inlined_call_operand.hbm [shape: f32[16,32], index: 0, kind: input, shape index: {}]   ;;  %s897_s1 = inlined_call_operand.hbm [shape: f32[32,64], index: 1, kind: input, shape index: {}]   ;;  %s898_s2 = inlined_call_operand.vmem [shape: f32[1,64], index: 2, kind: input, shape index: {}]   ;;  %s899_s3 = inlined_call_operand.hbm [shape: f32[16,64], index: 3, kind: output, shape index: {}]  }
   0x1   :  { %10 = vsyncpa [#allocation3 + $0x1], 0 }
   0x2   :  { %11 = vsyncpa [#allocation6], 0 }
   0x3   :  { %12 = vsyncpa [#allocation4], 0 }
   0x4   :  { %14 = vsyncpa [#allocation4 + $0x1], 0  ;;  %s720_s12 = smov 0   ;;  %s722_s13 = smov 0  }
   0x5   :  { %s724_s14 = smov 0   ;;  %s726_s15 = smov 0  }
   0x6   :  { %s728_s16 = smov 0   ;;  %s730_s17 = smov 0  }
   0x7 LB: > { %s442_s18 = sadd.s32 4294967295, %s691_s17   ;;  %s443_s19 = sadd.s32 4294967294, %s691_s17   ;;  %s691_s17 = sphi %s730_s17, %s20_s17   ;;  %s687_s16 = sphi %s728_s16, %s917_s16   ;;  %s683_s15 = sphi %s726_s15, %s916_s15   ;;  %s679_s14 = sphi %s724_s14, %s915_s14   ;;  %s675_s13 = sphi %s722_s13, %s914_s13   ;;  %s671_s12 = sphi %s720_s12, %s913_s12  }
   0x8   : > { %p52_p0 = scmp.ne.s32.totalorder %s675_s13, %s671_s12  ;;  %p754_p1 = scmp.eq.s32.totalorder %s442_s18, 0 }
   0x9   : > { %p758_p2 = scmp.eq.s32.totalorder %s442_s18, 1  ;;  %p136_p3 = scmp.eq.s32.totalorder %s443_s19, 1 }
   0xa   : > { %p764_p4 = por %p754_p1, %p52_p0  ;;  %p444_p5 = scmp.ge.s32.totalorder %s691_s17, 1 }
   0xb   : > { %p769_p6 = por %p136_p3, %p52_p0  ;;  %p143_p7 = scmp.lt.s32.totalorder %s691_s17, 3 }
   0xc   : > { %s903_s22 = scalar_select %p764_p4, 1, 0 }
   0xd   : > { %s904_s23 = scalar_select %p769_p6, 1, 0 }
   0xe   : > { %p774_p8 = pnand %p444_p5, %p143_p7  ;;  %s693_s25 = smov [#allocation5]  }
   0xf   : > { %s157_s26 = sshll.u32 %s693_s25, 4  ;;  %s32_s28 = sadd.s32 1, %s687_s16  ;;  %s158_s26 = int_to_ptr.vmem [resolvable:$true] %s157_s26 }
  0x10   : > { %p484_p9 = pneg %p774_p8  ;;  %s564_s29 = scalar_lea.vmem %s158_s26, 512 }
  0x11   : > { %p565_p13 = scmp.ne.s32.totalorder %s158_s26, %s564_s29  ;;  %p572_p5 = scmp.lt.s32.totalorder %s158_s26, %s158_s26 }
  0x12   : > { %p783_p11 = pnand %p484_p9, %p754_p1  ;;  %p573_p7 = scmp.lt.s32.totalorder %s564_s29, %s564_s29 }
  0x14   : > { %p555_p12 = pneg %p783_p11  ;;  %p574_p6 = por %p573_p7, %p572_p5 }
  0x16   : > { %p567_p0 = pnand %p565_p13, %p555_p12 }
  0x18   : > { %p568_p3 = pneg %p567_p0 }
  0x1a   : > { %p575_p4 = pnand %p574_p6, %p568_p3 }
  0x1c   : > { %578 = shalt.err (!%p575_p4)
}
  0x1d   : > { %s694_s30 = smov 128   ;;  %s695_s4 = smov 8  }
  0x1e   : > { %487 = dma.hbm_to_vmem [thread:$0]  (!%p783_p11), %s897_s1, 512, %s158_s26, [#allocation6], %s694_s30, %s694_s30, %s695_s4  }
  0x1f   : > { %p34_p6 = scmp.ge.s32.totalorder %s32_s28, 2  ;;  %s39_s7 = sadd.s32 1, %s679_s14 }
  0x20   : > { %p46_p4 = scmp.ne.s32.totalorder %s679_s14, %s675_s13  ;;  %p47_p9 = scmp.eq.s32.totalorder %s691_s17, 0 }
  0x21   : > { %s919_s28 = smov (%p34_p6, %s32_s28), 0  ;;  %p497_p0 = scmp.lt.s32.totalorder %s691_s17, 2 }
  0x22   : > { %p801_p12 = por %p47_p9, %p46_p4  ;;  %p807_p13 = por %p758_p2, %p46_p4 }
  0x23   : > { %s36_s10 = ssub.s32 %s687_s16, %s919_s28  ;;  %s177_s11 = sand.u32 1, %s679_s14  }
  0x24   : > { %p37_p11 = scmp.eq.s32.totalorder %s36_s10, 0  ;;  %s448_s18 = sshll.u32 %s177_s11, 3 }
  0x25   : > { %s449_s25 = sshll.u32 %s687_s16, 7  ;;  %s181_s30 = scalar_lea.vmem [#allocation2], %s448_s18 }
  0x26   : > { %s816_s19 = scalar_select %p37_p11, %s679_s14, %s39_s7  }
  0x27   : > { %s186_s29 = scalar_lea.hbm %s896_s0, %s449_s25  ;;  %s188_s4 = sshll.u32 %s181_s30, 4  ;;  %s189_s4 = int_to_ptr.vmem [resolvable:$true] %s188_s4 }
  0x28   : > { %p824_p2 = pnand %p497_p0, %p801_p12  ;;  %s178_s5 = scalar_lea.sflag [#allocation3], %s177_s11 }
  0x29   : > { %s592_s6 = scalar_lea.vmem %s189_s4, 128  ;;  %s696_s7 = smov [#allocation2]  }
  0x2a   : > { %p581_p3 = pneg %p824_p2  ;;  %p593_p5 = scmp.ne.s32.totalorder %s189_s4, %s592_s6 }
  0x2b   : > { %s597_s10 = sshll.u32 %s696_s7, 4  ;;  %s598_s10 = int_to_ptr.vmem [resolvable:$false] %s597_s10 }
  0x2c   : > { %p595_p7 = pnand %p593_p5, %p581_p3  ;;  %s599_s25 = scalar_lea.vmem %s598_s10, 256 }
  0x2d   : > { %p600_p4 = scmp.lt.s32.totalorder %s189_s4, %s598_s10  ;;  %p601_p9 = scmp.lt.s32.totalorder %s599_s25, %s592_s6 }
  0x2e   : > { %p596_p6 = pneg %p595_p7 }
  0x2f   : > { %p602_p11 = por %p601_p9, %p600_p4 }
  0x31   : > { %p603_p10 = pnand %p602_p11, %p596_p6 }
  0x33   : > { %606 = shalt.err (!%p603_p10)
}
  0x34   : > { %491 = dma.hbm_to_vmem [thread:$0]  (!%p824_p2), %s186_s29, 128, %s189_s4, %s178_s5  }
  0x35   : > { %197 = sbr.rel (%p774_p8) target bundleno = 278 (0x116), region = 32  ;;  %s835_s8 = sand.u32 (!%p774_p8), 1, %s675_s13  }
  0x36   : > { %s451_s11 = sshll.u32 (!%p774_p8), %s835_s8, 3  ;;  %s200_s18 = scalar_lea.sflag (!%p774_p8), [#allocation3], %s835_s8 }
  0x37   : > { %s203_s26 = scalar_lea.vmem (!%p774_p8), [#allocation2], %s451_s11  ;;  %p910_p12 = scmp.ne.s32.totalorder (!%p774_p8), %s903_s22, 0 }
  0x3a   : > { %658 = dma.done.wait (%p910_p12), %s200_s18, 128  }
  0x3b   : > { %660 = vsyncadd (%p910_p12), %s200_s18, 4294967168 }
  0x3c   : > { %662 = dma.done.wait (%p754_p1), [#allocation6], 512  }
  0x3d   : > { %664 = vsyncadd (%p754_p1), [#allocation6], 4294966784  ;;  %v697_v0 = vmov 0.0   ;;  %vm698_vm0 = vmmov 0   ;;  %v240_v1 = vld [vmem:[#allocation5 + $0x18] sm:$0xff]  ;;  %v239_v2 = vld [vmem:[#allocation5 + $0x10] sm:$0xff] }
  0x3e   : > { %465 = vmatprep.subr.mxu0 %v697_v0  ;;  %473 = vmatprep.mubr.msk.f32.mxu0 %vm698_vm0, %v697_v0  ;;  %v238_v3 = vld [vmem:[#allocation5 + $0x8] sm:$0xff]  ;;  %v237_v4 = vld [vmem:[#allocation5] sm:$0xff]  ;;  %v236_v5 = vld [vmem:[%s203_s26] sm:$0xff]  ;;  %vm248_vm1 = vcmask 261120   ;;  %s457_s24 = sshll.u32 %s683_s15, 7  ;;  %s232_s27 = scalar_lea.vmem [#allocation7], %s451_s11 }
  0x3f   : > { %466 = vmatpush3.msra.mxu0 %v240_v1  ;;  %v454_v6 = vld [vmem:[%s898_s2] ss:$0 sm:$0xff]  ;;  %s339_s29 = sshll.u32 %s232_s27, 4  ;;  %vm322_vm2 = vcmask 523264   ;;  %s854_s21 = scalar_lea.hbm %s899_s3, %s457_s24  ;;  %s340_s29 = int_to_ptr.vmem [resolvable:$true] %s339_s29 }
  0x40   : > { %467 = vmatprep.subr.mxu0 %v697_v0  ;;  %s325_s5 = scalar_lea.sflag [#allocation4], %s835_s8  ;;  %s607_s6 = scalar_lea.vmem %s340_s29, 128 }
  0x41   : > { %468 = vmatpush3.msra.mxu0 %v239_v2  ;;  %p608_p1 = scmp.ne.s32.totalorder %s340_s29, %s607_s6  ;;  %s699_s15 = smov [#allocation7]  }
  0x42   : > { %469 = vmatprep.subr.mxu0 %v697_v0  ;;  %s611_s7 = sshll.u32 %s699_s15, 4  ;;  %s612_s7 = int_to_ptr.vmem [resolvable:$false] %s611_s7 }
  0x43   : > { %470 = vmatpush3.msra.mxu0 %v238_v3  ;;  %p609_p8 = pnand %p608_p1, %p807_p13  ;;  %s613_s10 = scalar_lea.vmem %s612_s7, 256 }
  0x44   : > { %471 = vmatprep.subr.mxu0 %v697_v0  ;;  %p614_p0 = scmp.lt.s32.totalorder %s340_s29, %s612_s7  ;;  %p615_p2 = scmp.lt.s32.totalorder %s613_s10, %s607_s6 }
  0x45   : > { %472 = vmatpush3.msra.mxu0 %v237_v4  ;;  %p610_p10 = pneg %p609_p8 }
  0x46   : > { %474 = vmatmul.mubr.msk.f32.vlgmr.msra.gmra.mxu0 %vm248_vm1, %v236_v5  ;;  %p616_p3 = por %p615_p2, %p614_p0 }
  0x48   : > { %p617_p5 = pnand %p616_p3, %p610_p10 }
 0x106   : > { %v318_v7 = vpop.f32.mrf.mxu0 }
 0x107   : > { %v319_v8 = vadd.f32 %v454_v6, %v318_v7 }
 0x108   : > { %v475_v9 = vpop.f32.mrf.mxu0 }
 0x109   : > { %323 = vst.msk [vmem:[%s232_s27] sm:$0xff] %vm322_vm2, %v319_v8 }
 0x10a   : > { %620 = shalt.err (!%p617_p5)
}
 0x10b   : > { %s621_s25 = scalar_lea.hbm %s854_s21, 128  ;;  %s625_s18 = scalar_lea.hbm %s899_s3, 256 }
 0x10c   : > { %p622_p7 = scmp.ne.s32.totalorder %s854_s21, %s621_s25  ;;  %p626_p9 = scmp.lt.s32.totalorder %s854_s21, %s899_s3 }
 0x10d   : > { %p627_p11 = scmp.lt.s32.totalorder %s625_s18, %s621_s25 }
 0x10e   : > { %p623_p6 = pnand %p622_p7, %p807_p13 }
 0x10f   : > { %p628_p12 = por %p627_p11, %p626_p9 }
 0x110   : > { %p624_p4 = pneg %p623_p6 }
 0x112   : > { %p629_p1 = pnand %p628_p12, %p624_p4 }
 0x114   : > { %632 = shalt.err (!%p629_p1)
}
 0x115   : > { %482 = dma.vmem_to_hbm [thread:$0]  (%p807_p13), %s340_s29, 128, %s854_s21, %s325_s5  }
 0x116 PF: > { %s351_s22 = sand.u32 1, %s671_s12   ;;  %p911_p8 = scmp.ne.s32.totalorder %s904_s23, 0 }
 0x117   : > { %p912_p10 = scmp.ge.s32.totalorder %s691_s17, 2  ;;  %s352_s24 = scalar_lea.sflag [#allocation4], %s351_s22 }
 0x119   : > { %p493_p0 = pnand %p912_p10, %p911_p8 }
 0x11b   : > { %p494_p2 = pneg %p493_p0 }
 0x11d   : > { %666 = dma.done.wait (%p494_p2), %s352_s24, 128  }
 0x11e   : > { %668 = vsyncadd (%p494_p2), %s352_s24, 4294967168  ;;  %s20_s17 = sadd.s32 1, %s691_s17   ;;  %s913_s12 = smov %s675_s13 }
 0x11f   : > { %p17_p3 = scmp.ge.s32.totalorder %s20_s17, 4   ;;  %s914_s13 = smov %s679_s14 }
 0x120   : > { %s915_s14 = smov %s816_s19  ;;  %s916_s15 = smov %s687_s16 }
 0x121   : > { %s917_s16 = smov %s919_s28  ;;  %19 = sbr.rel (!%p17_p3) target bundleno = 7 (0x7), region = 85 }
 0x126   :  { %357 = vsyncpa [#allocation3], 1 }
 0x127   :  { %359 = vsyncpa [#allocation3 + $0x1], 1 }
 0x128   :  { %360 = vsyncpa [#allocation6], 1 }
 0x129   :  { %361 = vsyncpa [#allocation4], 1 }
 0x12a   :  { %363 = vsyncpa [#allocation4 + $0x1], 1 }

</bundles_post_ra>
